<compile_context>
chip_gen: v6e
topology: v6e:2x2x1
jax: 0.10.0
libtpu: 0.0.40
codegen_flags: <defaults>
</compile_context>

<pallas_src>
import math
from functools import partial

import jax
import jax.numpy as jnp
from jax.experimental import pallas as pl
from jax.experimental.pallas import tpu as pltpu

BN_EPS = 1e-5
LANE = 128


# ---------------------------------------------------------------------------
# Small helpers
# ---------------------------------------------------------------------------
def _round_up(x, m):
    return ((x + m - 1) // m) * m


def _largest_divisor_leq(n, cap):
    cap = max(1, min(int(cap), n))
    for t in range(cap, 0, -1):
        if n % t == 0:
            return t
    return 1


def _vmem_limit_bytes():
    """Generation-aware scoped-VMEM limit: ~3/4 of physical capacity
    (96 MiB on 128 MiB chips like v5e/v6e, 48 MiB on v7x)."""
    try:
        cap = int(pltpu.get_tpu_info().vmem_capacity_bytes)
    except Exception:
        return None
    return (cap * 3) // 4


def _compiler_params(dimension_semantics):
    kwargs = dict(dimension_semantics=dimension_semantics)
    limit = _vmem_limit_bytes()
    if limit is not None:
        kwargs["vmem_limit_bytes"] = limit
    return pltpu.CompilerParams(**kwargs)


def _pad_vec(v, n):
    if v.shape[0] == n:
        return v
    return jnp.zeros((n,), v.dtype).at[: v.shape[0]].set(v)


def _pad_mat(w, r, c):
    r0, c0 = w.shape
    if (r0, c0) == (r, c):
        return w
    return jnp.zeros((r, c), w.dtype).at[:r0, :c0].set(w)


def _taps_3x3(w, c):
    """(3,3,Cin,Cout) -> zero channel-padded (9, c, c); tap index = ky*3+kx."""
    cin, cout = w.shape[2], w.shape[3]
    wp = w
    if (cin, cout) != (c, c):
        wp = jnp.zeros((3, 3, c, c), w.dtype).at[:, :, :cin, :cout].set(w)
    return wp.reshape(9, c, c)


def fold_bn(gamma, beta, mean, var):
    scale = gamma / jnp.sqrt(var + BN_EPS)
    bias = beta - mean * scale
    return scale, bias


# ---------------------------------------------------------------------------
# 1x1 conv (+BN, +ReLU) as a tiled MXU matmul kernel (conv1 stage)
# ---------------------------------------------------------------------------
def _pw_kernel(x_ref, w_ref, s_ref, b_ref, o_ref, acc_ref, *, relu):
    k = pl.program_id(1)

    @pl.when(k == 0)
    def _():
        acc_ref[...] = jnp.zeros_like(acc_ref)

    acc_ref[...] += jnp.dot(x_ref[...], w_ref[...],
                            preferred_element_type=jnp.float32)

    @pl.when(k == pl.num_programs(1) - 1)
    def _():
        y = acc_ref[...] * s_ref[...] + b_ref[...]
        if relu:
            y = jnp.maximum(y, 0.0)
        o_ref[...] = y.astype(o_ref.dtype)


def pw_conv_bn(x2d, w, scale, bias, *, relu=True, out_dtype=jnp.float32,
               block_m=None, block_k=512):
    """1x1 conv + folded BN (+ReLU) as a pipelined, tiled (M,K)@(K,N) matmul.

    M is tiled with a "parallel" grid axis, K (Cin) with an "arbitrary"
    reduction axis + f32 VMEM accumulator.  The K tile always divides K
    (ragged K would silently accumulate garbage); M raggedness is safe.
    """
    M, K = x2d.shape
    Cout = w.shape[1]
    assert K % LANE == 0 and Cout % LANE == 0, "channels must be lane-padded"

    limit = _vmem_limit_bytes()
    if block_m is None:
        # bigger M tiles on 128 MiB chips (v5e/v6e); 512 on v7x / unknown.
        block_m = 1024 if (limit is not None and limit > (64 << 20)) else 512
    tm = block_m if M >= block_m else M
    if K <= block_k:
        tk = K
    else:
        tk = max(t for t in range(LANE, block_k + 1, LANE) if K % t == 0)
    grid = (pl.cdiv(M, tm), K // tk)

    return pl.pallas_call(
        partial(_pw_kernel, relu=relu),
        out_shape=jax.ShapeDtypeStruct((M, Cout), out_dtype),
        grid=grid,
        in_specs=[
            pl.BlockSpec((tm, tk), lambda m, k: (m, k)),
            pl.BlockSpec((tk, Cout), lambda m, k: (k, 0)),
            pl.BlockSpec((1, Cout), lambda m, k: (0, 0)),
            pl.BlockSpec((1, Cout), lambda m, k: (0, 0)),
        ],
        out_specs=pl.BlockSpec((tm, Cout), lambda m, k: (m, 0)),
        scratch_shapes=[pltpu.VMEM((tm, Cout), jnp.float32)],
        compiler_params=_compiler_params(("parallel", "arbitrary")),
    )(x2d, w, scale.reshape(1, -1), bias.reshape(1, -1))


# ---------------------------------------------------------------------------
# Fused "tail" kernel:
#   sum_d relu(bn2(conv3x3_d(out1)))  ->  conv3 (1x1) -> bn3 -> +residual -> relu
# spatially row-tiled with a halo'd, double-buffered manual DMA of out1.
# ---------------------------------------------------------------------------
def _tail_kernel(x_hbm, res_ref, w2_ref, w3_ref, s2_ref, b2_ref,
                 s3_ref, b3_ref, o_ref, xbuf_ref, sem_ref, *,
                 tile_h, W, pad, dilations, n_row_blocks, padded_h):
    n = pl.program_id(0)
    hi = pl.program_id(1)
    halo_h = tile_h + 2 * pad
    C = w2_ref.shape[-1]            # P_p  (3x3 channels, lane-padded)
    Cout = o_ref.shape[-1]          # Cout_p
    rows = tile_h * W

    # ---- manual, double-buffered halo DMA of the padded conv1 output ----
    def start_copy(block, slot):
        pltpu.make_async_copy(
            x_hbm.at[pl.ds(n * padded_h + block * tile_h, halo_h)],
            xbuf_ref.at[slot], sem_ref.at[slot]).start()

    def wait_copy(slot):
        pltpu.make_async_copy(
            x_hbm.at[pl.ds(0, halo_h)],
            xbuf_ref.at[slot], sem_ref.at[slot]).wait()

    # Prime the pipeline at the start of every image.  Safe under megacore
    # splitting of the (parallel) batch axis: no state crosses images, and the
    # row-block axis is "arbitrary" (in-order) so slot parity is consistent.
    @pl.when(hi == 0)
    def _():
        start_copy(0, 0)

    slot = hi % 2
    wait_copy(slot)

    @pl.when(hi + 1 < n_row_blocks)
    def _():
        start_copy(hi + 1, 1 - slot)

    xh = xbuf_ref[slot]             # (halo_h, W + 2*pad, C), compute dtype
    s2 = s2_ref[...]
    b2 = b2_ref[...]

    # ---- 3x3 branches: per-tap MXU matmuls, f32 accumulation ----
    branch = jnp.zeros((rows, C), jnp.float32)
    for di, d in enumerate(dilations):
        off = pad - d
        conv = jnp.zeros((rows, C), jnp.float32)
        for ky in range(3):
            for kx in range(3):
                y0 = off + ky * d
                x0 = off + kx * d
                win = xh[y0:y0 + tile_h, x0:x0 + W, :].reshape(rows, C)
                conv = conv + jnp.dot(win, w2_ref[di, 3 * ky + kx],
                                      preferred_element_type=jnp.float32)
        branch = branch + jnp.maximum(conv * s2 + b2, 0.0)

    # ---- conv3 (1x1) + bn3 + residual (f32) + relu, single HBM write ----
    y = jnp.dot(branch.astype(w3_ref.dtype), w3_ref[...],
                preferred_element_type=jnp.float32)
    y = y * s3_ref[...] + b3_ref[...]
    y = y + res_ref[0].reshape(rows, Cout)
    y = jnp.maximum(y, 0.0)
    o_ref[0] = y.reshape(tile_h, W, Cout).astype(o_ref.dtype)


def _pick_tile_h(H, W, P_p, Cout_p, cd_bytes, limit):
    limit = limit if limit is not None else (64 << 20)
    # Dominant per-row VMEM cost: 2 halo input slots (compute dtype), residual
    # + output blocks (f32, double buffered) and a few f32 row temporaries.
    per_row = W * (2 * P_p * cd_bytes + 4 * Cout_p * 4 + 4 * P_p * 4)
    target = max(1, (limit // 4) // max(per_row, 1))
    return _largest_divisor_leq(H, min(target, 256))


def fused_tail(out1_padded, residual, w2s, w3, s2, b2, s3, b3, *,
               dilations, tile_h, pad, N, H, W, out_dtype=jnp.float32):
    Hp, Wp = H + 2 * pad, W + 2 * pad
    P_p = w2s.shape[-1]
    Cout_p = w3.shape[-1]
    n_d = w2s.shape[0]
    nH = H // tile_h
    cd = out1_padded.dtype

    return pl.pallas_call(
        partial(_tail_kernel, tile_h=tile_h, W=W, pad=pad,
                dilations=tuple(dilations), n_row_blocks=nH, padded_h=Hp),
        out_shape=jax.ShapeDtypeStruct((N, H, W, Cout_p), out_dtype),
        grid=(N, nH),
        in_specs=[
            pl.BlockSpec(memory_space=pl.ANY),                          # out1 (padded, HBM)
            pl.BlockSpec((1, tile_h, W, Cout_p), lambda n, h: (n, h, 0, 0)),  # residual f32
            pl.BlockSpec((n_d, 9, P_p, P_p), lambda n, h: (0, 0, 0, 0)),
            pl.BlockSpec((P_p, Cout_p), lambda n, h: (0, 0)),
            pl.BlockSpec((1, P_p), lambda n, h: (0, 0)),
            pl.BlockSpec((1, P_p), lambda n, h: (0, 0)),
            pl.BlockSpec((1, Cout_p), lambda n, h: (0, 0)),
            pl.BlockSpec((1, Cout_p), lambda n, h: (0, 0)),
        ],
        out_specs=pl.BlockSpec((1, tile_h, W, Cout_p), lambda n, h: (n, h, 0, 0)),
        scratch_shapes=[
            pltpu.VMEM((2, tile_h + 2 * pad, Wp, P_p), cd),   # halo double buffer
            pltpu.SemaphoreType.DMA((2,)),
        ],
        compiler_params=_compiler_params(("parallel", "arbitrary")),
    )(out1_padded, residual, w2s, w3,
      s2.reshape(1, -1), b2.reshape(1, -1), s3.reshape(1, -1), b3.reshape(1, -1))


# ---------------------------------------------------------------------------
# Wrapper (glue in plain JAX)
# ---------------------------------------------------------------------------
def bottleneck_forward(x_nchw, params, dilated=True, compute_dtype=jnp.bfloat16,
                       tile_h=None):
    # x_nchw: (N, inplanes, H, W) with inplanes == 4*planes, stride == 1,
    # downsample == None  ->  residual is x itself.
    # TODO(synk): keep the surrounding model NHWC end-to-end to drop the
    #             boundary transposes (full-tensor HBM round trips).
    x = jnp.transpose(x_nchw, (0, 2, 3, 1)).astype(jnp.float32)  # NHWC, f32
    N, H, W, Cin = x.shape
    P = params["w1"].shape[1]
    Cout = params["w3"].shape[1]
    assert Cin == Cout, "downsample=None Bottleneck needs inplanes == 4*planes"

    cd = compute_dtype
    cd_bytes = jnp.dtype(cd).itemsize
    Cin_p = _round_up(Cin, LANE)
    P_p = _round_up(P, LANE)
    Cout_p = _round_up(Cout, LANE)

    s1, b1 = fold_bn(*params["bn1"])
    s2, b2 = fold_bn(*params["bn2"])
    s3, b3 = fold_bn(*params["bn3"])

    w1 = _pad_mat(params["w1"], Cin_p, P_p).astype(cd)
    w3 = _pad_mat(params["w3"], P_p, Cout_p).astype(cd)
    if dilated:
        dils = (1, 2, 3)
        w2s = jnp.stack([_taps_3x3(params["w2"], P_p),
                         _taps_3x3(params["wd2"], P_p),
                         _taps_3x3(params["wd3"], P_p)]).astype(cd)
    else:
        dils = (1,)
        w2s = _taps_3x3(params["w2"], P_p)[None].astype(cd)
    pad = max(dils)

    # Residual stays f32 (added on the f32 accumulator); compute-dtype copy
    # only feeds the conv1 matmul.
    x_res = jnp.pad(x, ((0, 0), (0, 0), (0, 0), (0, Cout_p - Cin)))    # f32
    M = N * H * W
    x2d = x_res.reshape(M, Cin_p).astype(cd)

    # conv1 (1x1) + bn1 + relu  (tiled / pipelined / f32 accumulate)
    out1 = pw_conv_bn(x2d, w1, _pad_vec(s1, P_p), _pad_vec(b1, P_p),
                      relu=True, out_dtype=cd).reshape(N, H, W, P_p)

    # Spatial pad once; the tail kernel row-tiles it with a halo'd manual DMA.
    Hp, Wp = H + 2 * pad, W + 2 * pad
    out1p = jnp.pad(out1, ((0, 0), (pad, pad), (pad, pad), (0, 0)))
    out1p = out1p.reshape(N * Hp, Wp, P_p)

    limit = _vmem_limit_bytes()
    if tile_h is None:
        th = _pick_tile_h(H, W, P_p, Cout_p, cd_bytes, limit)
    else:
        th = _largest_divisor_leq(H, tile_h)

    # conv2/conv_dilated2/conv_dilated3 + bn2 + relu + sum
    #   + conv3 + bn3 + residual + relu        (one fused kernel, one HBM write)
    out = fused_tail(out1p, x_res, w2s, w3,
                     _pad_vec(s2, P_p), _pad_vec(b2, P_p),
                     _pad_vec(s3, Cout_p), _pad_vec(b3, Cout_p),
                     dilations=dils, tile_h=th, pad=pad, N=N, H=H, W=W,
                     out_dtype=jnp.float32)

    out = out[:, :, :, :Cout]
    return jnp.transpose(out, (0, 3, 1, 2))  # back to NCHW


# ---------------------------------------------------------------------------
# Pure-JAX reference for correctness checking
# ---------------------------------------------------------------------------
def ref_forward(x_nchw, params, dilated=True):
    x = jnp.transpose(x_nchw, (0, 2, 3, 1))
    s1, b1 = fold_bn(*params["bn1"])
    s2, b2 = fold_bn(*params["bn2"])
    s3, b3 = fold_bn(*params["bn3"])
    relu = lambda t: jnp.maximum(t, 0.0)

    def conv1x1(y, w):
        return jnp.einsum("nhwc,co->nhwo", y, w)

    def conv3x3(y, w, d):
        return jax.lax.conv_general_dilated(
            y, w, window_strides=(1, 1), padding=[(d, d), (d, d)],
            rhs_dilation=(d, d),
            dimension_numbers=("NHWC", "HWIO", "NHWC"))

    out = relu(conv1x1(x, params["w1"]) * s1 + b1)
    out2 = relu(conv3x3(out, params["w2"], 1) * s2 + b2)
    if dilated:
        l2 = relu(conv3x3(out, params["wd2"], 2) * s2 + b2)
        l3 = relu(conv3x3(out, params["wd3"], 3) * s2 + b2)
        out2 = out2 + l2 + l3
    out3 = conv1x1(out2, params["w3"]) * s3 + b3 + x
    return jnp.transpose(relu(out3), (0, 3, 1, 2))


# ---------------------------------------------------------------------------
# Main
# ---------------------------------------------------------------------------
if __name__ == "__main__":
    planes = 8
    inplanes = planes * 4          # residual add requires inplanes == 4*planes
    N, H, W = 2, 16, 16

    key = jax.random.PRNGKey(0)
    ks = jax.random.split(key, 20)

    def winit(k, shape, fan_in):
        return jax.random.normal(k, shape, jnp.float32) * (1.0 / math.sqrt(fan_in))

    def bninit(k0, k1, k2, k3, c):
        gamma = jax.random.uniform(k0, (c,), jnp.float32, 0.5, 1.5)
        beta = jax.random.normal(k1, (c,), jnp.float32) * 0.1
        mean = jax.random.normal(k2, (c,), jnp.float32) * 0.1
        var = jax.random.uniform(k3, (c,), jnp.float32, 0.5, 1.5)
        return (gamma, beta, mean, var)

    params = {
        "w1": winit(ks[0], (inplanes, planes), inplanes),          # 1x1
        "w2": winit(ks[1], (3, 3, planes, planes), 9 * planes),    # 3x3, dil=1
        "wd2": winit(ks[2], (3, 3, planes, planes), 9 * planes),   # 3x3, dil=2
        "wd3": winit(ks[3], (3, 3, planes, planes), 9 * planes),   # 3x3, dil=3
        "w3": winit(ks[4], (planes, planes * 4), planes),          # 1x1
        "bn1": bninit(ks[5], ks[6], ks[7], ks[8], planes),
        "bn2": bninit(ks[9], ks[10], ks[11], ks[12], planes),
        "bn3": bninit(ks[13], ks[14], ks[15], ks[16], planes * 4),
    }

    x = jax.random.normal(ks[17], (N, inplanes, H, W), jnp.float32)

    y_ref = jax.block_until_ready(ref_forward(x, params, dilated=True))

    # f32 compute path, auto row tile: strict numerical check.
    y32 = jax.block_until_ready(
        bottleneck_forward(x, params, dilated=True, compute_dtype=jnp.float32))
    assert y32.shape == (N, inplanes, H, W), y32.shape
    assert jnp.allclose(y32, y_ref, atol=1e-3, rtol=1e-3), float(
        jnp.max(jnp.abs(y32 - y_ref)))

    # f32 path with small row tiles: exercises the multi-row-block grid and the
    # double-buffered halo DMA prefetch path.
    y32t = jax.block_until_ready(
        bottleneck_forward(x, params, dilated=True, compute_dtype=jnp.float32,
                           tile_h=4))
    assert jnp.allclose(y32t, y_ref, atol=1e-3, rtol=1e-3), float(
        jnp.max(jnp.abs(y32t - y_ref)))

    # bf16 MXU path (default): looser tolerance due to bf16 rounding.
    ybf = jax.block_until_ready(
        bottleneck_forward(x, params, dilated=True, compute_dtype=jnp.bfloat16,
                           tile_h=8))
    assert ybf.shape == (N, inplanes, H, W), ybf.shape
    assert jnp.allclose(ybf, y_ref, atol=1e-1, rtol=5e-2), float(
        jnp.max(jnp.abs(ybf - y_ref)))

    # Non-dilated variant.
    y_nd = jax.block_until_ready(
        bottleneck_forward(x, params, dilated=False, compute_dtype=jnp.float32,
                           tile_h=8))
    y_nd_ref = jax.block_until_ready(ref_forward(x, params, dilated=False))
    assert jnp.allclose(y_nd, y_nd_ref, atol=1e-3, rtol=1e-3), float(
        jnp.max(jnp.abs(y_nd - y_nd_ref)))

    print("KERNEL_OK")
</pallas_src>

<mosaic_0001>
module attributes {stable_mosaic.version = 11 : i64} {
  func.func @_pw_kernel(%arg0: i32, %arg1: i32, %arg2: memref<512x128xf32, #tpu.memory_space<vmem>>, %arg3: memref<128x128xf32, #tpu.memory_space<vmem>>, %arg4: memref<1x128xf32, #tpu.memory_space<vmem>>, %arg5: memref<1x128xf32, #tpu.memory_space<vmem>>, %arg6: memref<512x128xf32, #tpu.memory_space<vmem>>, %arg7: memref<512x128xf32, #tpu.memory_space<vmem>>) attributes {dimension_semantics = [#tpu.dimension_semantics<parallel>, #tpu.dimension_semantics<arbitrary>], iteration_bounds = array<i64: 1, 1>, scalar_prefetch = 0 : i64, scratch_operands = 1 : i64, tpu.core_type = #tpu.core_type<tc>, window_params = [{transform_indices = @transform_0, window_bounds = array<i64: 512, 128>}, {transform_indices = @transform_1, window_bounds = array<i64: 128, 128>}, {pipeline_mode = #tpu.pipeline_mode<synchronous>, transform_indices = @transform_2, window_bounds = array<i64: 1, 128>}, {pipeline_mode = #tpu.pipeline_mode<synchronous>, transform_indices = @transform_3, window_bounds = array<i64: 1, 128>}, {transform_indices = @transform_4, window_bounds = array<i64: 512, 128>}]} {
    %c0_i32 = arith.constant 0 : i32
    %0 = arith.cmpi eq, %arg1, %c0_i32 : i32
    %1 = arith.extui %0 : i1 to i32
    %c0_i32_0 = arith.constant 0 : i32
    %2 = arith.cmpi ne, %1, %c0_i32_0 : i32
    scf.if %2 {
      %cst_10 = arith.constant 0.000000e+00 : f32
      %12 = vector.broadcast %cst_10 : f32 to vector<512x128xf32>
      %c0_11 = arith.constant 0 : index
      %c0_12 = arith.constant 0 : index
      %13 = vector.load %arg7[%c0_11, %c0_12] : memref<512x128xf32, #tpu.memory_space<vmem>>, vector<512x128xf32>
      tpu.vector_store %arg7[%c0_11, %c0_12], %12 {strides = array<i32>} : memref<512x128xf32, #tpu.memory_space<vmem>>, vector<512x128xf32>,
    } else {
    }
    %c0 = arith.constant 0 : index
    %c0_1 = arith.constant 0 : index
    %3 = vector.load %arg7[%c0, %c0_1] : memref<512x128xf32, #tpu.memory_space<vmem>>, vector<512x128xf32>
    %c0_2 = arith.constant 0 : index
    %c0_3 = arith.constant 0 : index
    %4 = vector.load %arg2[%c0_2, %c0_3] : memref<512x128xf32, #tpu.memory_space<vmem>>, vector<512x128xf32>
    %c0_4 = arith.constant 0 : index
    %c0_5 = arith.constant 0 : index
    %5 = vector.load %arg3[%c0_4, %c0_5] : memref<128x128xf32, #tpu.memory_space<vmem>>, vector<128x128xf32>
    %cst = arith.constant dense<0.000000e+00> : vector<512x128xf32>
    %6 = tpu.matmul %4, %5, %cst {dimension_numbers = #tpu.dot_dimension_numbers<[1], [0], [0], [1], [0, 0, 1, 1], [], []>} : vector<512x128xf32>, vector<128x128xf32>, vector<512x128xf32> -> vector<512x128xf32>
    %7 = arith.addf %3, %6 : vector<512x128xf32>
    %c0_6 = arith.constant 0 : index
    %c0_7 = arith.constant 0 : index
    %8 = vector.load %arg7[%c0_6, %c0_7] : memref<512x128xf32, #tpu.memory_space<vmem>>, vector<512x128xf32>
    tpu.vector_store %arg7[%c0_6, %c0_7], %7 {strides = array<i32>} : memref<512x128xf32, #tpu.memory_space<vmem>>, vector<512x128xf32>,
    %c0_i32_8 = arith.constant 0 : i32
    %9 = arith.cmpi eq, %arg1, %c0_i32_8 : i32
    %10 = arith.extui %9 : i1 to i32
    %c0_i32_9 = arith.constant 0 : i32
    %11 = arith.cmpi ne, %10, %c0_i32_9 : i32
    scf.if %11 {
      %c0_10 = arith.constant 0 : index
      %c0_11 = arith.constant 0 : index
      %12 = vector.load %arg7[%c0_10, %c0_11] : memref<512x128xf32, #tpu.memory_space<vmem>>, vector<512x128xf32>
      %c0_12 = arith.constant 0 : index
      %c0_13 = arith.constant 0 : index
      %13 = vector.load %arg4[%c0_12, %c0_13] : memref<1x128xf32, #tpu.memory_space<vmem>>, vector<1x128xf32>
      %14 = vector.broadcast %13 : vector<1x128xf32> to vector<512x128xf32>
      %15 = arith.mulf %12, %14 : vector<512x128xf32>
      %c0_14 = arith.constant 0 : index
      %c0_15 = arith.constant 0 : index
      %16 = vector.load %arg5[%c0_14, %c0_15] : memref<1x128xf32, #tpu.memory_space<vmem>>, vector<1x128xf32>
      %17 = vector.broadcast %16 : vector<1x128xf32> to vector<512x128xf32>
      %18 = arith.addf %15, %17 : vector<512x128xf32>
      %cst_16 = arith.constant 0.000000e+00 : f32
      %19 = vector.broadcast %cst_16 : f32 to vector<512x128xf32>
      %20 = arith.maximumf %18, %19 : vector<512x128xf32>
      %c0_17 = arith.constant 0 : index
      %c0_18 = arith.constant 0 : index
      %21 = vector.load %arg6[%c0_17, %c0_18] : memref<512x128xf32, #tpu.memory_space<vmem>>, vector<512x128xf32>
      tpu.vector_store %arg6[%c0_17, %c0_18], %20 {strides = array<i32>} : memref<512x128xf32, #tpu.memory_space<vmem>>, vector<512x128xf32>,
    } else {
    }
    return
  }
  func.func @transform_0(%arg0: i32, %arg1: i32) -> (i32, i32) {
    %c0_i32 = arith.constant 0 : i32
    return %arg0, %arg1 : i32, i32
  }
  func.func @transform_1(%arg0: i32, %arg1: i32) -> (i32, i32) {
    %c0_i32 = arith.constant 0 : i32
    %c0_i32_0 = arith.constant 0 : i32
    return %arg1, %c0_i32 : i32, i32
  }
  func.func @transform_2(%arg0: i32, %arg1: i32) -> (i32, i32) {
    %c0_i32 = arith.constant 0 : i32
    %c0_i32_0 = arith.constant 0 : i32
    %c0_i32_1 = arith.constant 0 : i32
    return %c0_i32, %c0_i32_0 : i32, i32
  }
  func.func @transform_3(%arg0: i32, %arg1: i32) -> (i32, i32) {
    %c0_i32 = arith.constant 0 : i32
    %c0_i32_0 = arith.constant 0 : i32
    %c0_i32_1 = arith.constant 0 : i32
    return %c0_i32, %c0_i32_0 : i32, i32
  }
  func.func @transform_4(%arg0: i32, %arg1: i32) -> (i32, i32) {
    %c0_i32 = arith.constant 0 : i32
    %c0_i32_0 = arith.constant 0 : i32
    return %arg0, %c0_i32 : i32, i32
  }
}

</mosaic_0001>

<bundles_post_ra>
// kernel: tpu_custom_call.1
= control target key start
LH: loop header
LB: loop body
LE: loop exit
PB: predicated region body
PF: predicated region fallthrough
CT: control target
= control target key end

     0   :  { %9 = vsyncpa [#allocation4], 0  ;;  %s1625_s0 = inlined_call_operand.hbm [shape: f32[512,128], index: 0, kind: input, shape index: {}]   ;;  %s1626_s1 = inlined_call_operand.hbm [shape: f32[128,128], index: 1, kind: input, shape index: {}]   ;;  %s1627_s2 = inlined_call_operand.vmem [shape: f32[1,128], index: 2, kind: input, shape index: {}]   ;;  %s1628_s3 = inlined_call_operand.vmem [shape: f32[1,128], index: 3, kind: input, shape index: {}]   ;;  %s1629_s4 = inlined_call_operand.hbm [shape: f32[512,128], index: 4, kind: output, shape index: {}]  }
   0x1   :  { %10 = vsyncpa [#allocation7], 0 }
   0x2   :  { %11 = vsyncpa [#allocation5], 0  ;;  %s1439_s15 = smov [#allocation3]  }
   0x3   :  { %s17_s16 = sshll.u32 %s1439_s15, 4  ;;  %s18_s16 = int_to_ptr.vmem [resolvable:$true] %s17_s16 }
   0x4   :  { %s1381_s17 = scalar_lea.vmem %s18_s16, 8192  ;;  %p1386_p1 = scmp.lt.s32.totalorder %s18_s16, %s18_s16 }
   0x5   :  { %p1382_p0 = scmp.ne.s32.totalorder %s18_s16, %s1381_s17  ;;  %p1387_p2 = scmp.lt.s32.totalorder %s1381_s17, %s1381_s17 }
   0x7   :  { %p1388_p3 = por %p1387_p2, %p1386_p1 }
   0x9   :  { %p1389_p4 = pnand %p1388_p3, %p1382_p0 }
   0xb   :  { %1392 = shalt.err (!%p1389_p4)
}
   0xc   :  { %s1440_s18 = smov 128   ;;  %s1441_s19 = smov 8  }
   0xd   :  { %23 = dma.hbm_to_vmem [thread:$0]  %s1625_s0, 8192, %s18_s16, [#allocation4], %s1440_s18, %s1440_s18, %s1441_s19  }
   0xe   :  { %s1442_s22 = smov [#allocation6]  }
   0xf   :  { %s29_s23 = sshll.u32 %s1442_s22, 4  ;;  %s30_s23 = int_to_ptr.vmem [resolvable:$true] %s29_s23 }
  0x10   :  { %s1401_s24 = scalar_lea.vmem %s30_s23, 2048  ;;  %p1406_p6 = scmp.lt.s32.totalorder %s30_s23, %s30_s23 }
  0x11   :  { %p1402_p5 = scmp.ne.s32.totalorder %s30_s23, %s1401_s24  ;;  %p1407_p7 = scmp.lt.s32.totalorder %s1401_s24, %s1401_s24 }
  0x13   :  { %p1408_p8 = por %p1407_p7, %p1406_p6 }
  0x15   :  { %p1409_p9 = pnand %p1408_p8, %p1402_p5 }
  0x17   :  { %1412 = shalt.err (!%p1409_p9)
}
  0x18   :  { %35 = dma.hbm_to_vmem [thread:$0]  %s1626_s1, 2048, %s30_s23, [#allocation7], %s1440_s18, %s1440_s18, %s1441_s19  }
  0x19   :  { %1433 = dma.done.wait [#allocation4], 8192  }
  0x1a   :  { %1434 = vsyncadd [#allocation4], 4294959104 }
  0x1b   :  { %1435 = dma.done.wait [#allocation7], 2048  }
  0x1c   :  { %1436 = vsyncadd [#allocation7], 4294965248  ;;  %v257_v0 = vld [vmem:[#allocation6 + $0x78] sm:$0xff]  ;;  %v256_v1 = vld [vmem:[#allocation6 + $0x70] sm:$0xff] }
  0x1d   :  { %1208 = vmatprep.subr.mxu0 %v257_v0  ;;  %1336 = vmatprep.subr.mxu1 %v257_v0  ;;  %v255_v2 = vld [vmem:[#allocation6 + $0x68] sm:$0xff]  ;;  %v254_v3 = vld [vmem:[#allocation6 + $0x60] sm:$0xff]  ;;  %v253_v4 = vld [vmem:[#allocation6 + $0x58] sm:$0xff] }
  0x1e   :  { %1209 = vmatpush3.msra.mxu0 %v257_v0  ;;  %1352 = vmatpush3.msra.mxu1 %v257_v0  ;;  %v252_v5 = vld [vmem:[#allocation6 + $0x50] sm:$0xff]  ;;  %v251_v6 = vld [vmem:[#allocation6 + $0x48] sm:$0xff]  ;;  %v250_v7 = vld [vmem:[#allocation6 + $0x40] sm:$0xff] }
  0x1f   :  { %1210 = vmatprep.subr.mxu0 %v256_v1  ;;  %1337 = vmatprep.subr.mxu1 %v256_v1  ;;  %v249_v8 = vld [vmem:[#allocation6 + $0x38] sm:$0xff]  ;;  %v248_v9 = vld [vmem:[#allocation6 + $0x30] sm:$0xff]  ;;  %v247_v10 = vld [vmem:[#allocation6 + $0x28] sm:$0xff] }
  0x20   :  { %1211 = vmatpush3.msra.mxu0 %v256_v1  ;;  %1353 = vmatpush3.msra.mxu1 %v256_v1  ;;  %v246_v11 = vld [vmem:[#allocation6 + $0x20] sm:$0xff]  ;;  %v245_v12 = vld [vmem:[#allocation6 + $0x18] sm:$0xff]  ;;  %v244_v13 = vld [vmem:[#allocation6 + $0x10] sm:$0xff] }
  0x21   :  { %1212 = vmatprep.subr.mxu0 %v255_v2  ;;  %1338 = vmatprep.subr.mxu1 %v255_v2  ;;  %v243_v14 = vld [vmem:[#allocation6 + $0x8] sm:$0xff]  ;;  %v242_v15 = vld [vmem:[#allocation6] sm:$0xff]  ;;  %v180_v20 = vld [vmem:[#allocation3 + $0x10] sm:$0xff] }
  0x22   :  { %1213 = vmatpush3.msra.mxu0 %v255_v2  ;;  %1354 = vmatpush3.msra.mxu1 %v255_v2  ;;  %v178_v16 = vld [vmem:[#allocation3] sm:$0xff]  ;;  %v179_v18 = vld [vmem:[#allocation3 + $0x8] sm:$0xff]  ;;  %v212_v21 = vld [vmem:[#allocation3 + $0x110] sm:$0xff] }
  0x23   :  { %1214 = vmatprep.subr.mxu0 %v254_v3  ;;  %1339 = vmatprep.subr.mxu1 %v254_v3  ;;  %v210_v17 = vld [vmem:[#allocation3 + $0x100] sm:$0xff]  ;;  %v211_v19 = vld [vmem:[#allocation3 + $0x108] sm:$0xff]  ;;  %v181_v22 = vld [vmem:[#allocation3 + $0x18] sm:$0xff] }
  0x24   :  { %1215 = vmatpush3.msra.mxu0 %v254_v3  ;;  %1355 = vmatpush3.msra.mxu1 %v254_v3  ;;  %v213_v23 = vld [vmem:[#allocation3 + $0x118] sm:$0xff]  ;;  %v182_v24 = vld [vmem:[#allocation3 + $0x20] sm:$0xff]  ;;  %v183_v26 = vld [vmem:[#allocation3 + $0x28] sm:$0xff] }
  0x25   :  { %1216 = vmatprep.subr.mxu0 %v253_v4  ;;  %1340 = vmatprep.subr.mxu1 %v253_v4  ;;  %v214_v25 = vld [vmem:[#allocation3 + $0x120] sm:$0xff]  ;;  %v215_v27 = vld [vmem:[#allocation3 + $0x128] sm:$0xff]  ;;  %v184_v28 = vld [vmem:[#allocation3 + $0x30] sm:$0xff] }
  0x26   :  { %1217 = vmatpush3.msra.mxu0 %v253_v4  ;;  %1356 = vmatpush3.msra.mxu1 %v253_v4  ;;  %v216_v29 = vld [vmem:[#allocation3 + $0x130] sm:$0xff]  ;;  %v185_v30 = vld [vmem:[#allocation3 + $0x38] sm:$0xff]  ;;  %v186_v32 = vld [vmem:[#allocation3 + $0x40] sm:$0xff] }
  0x27   :  { %1218 = vmatprep.subr.mxu0 %v252_v5  ;;  %1341 = vmatprep.subr.mxu1 %v252_v5  ;;  %v217_v31 = vld [vmem:[#allocation3 + $0x138] sm:$0xff]  ;;  %v218_v33 = vld [vmem:[#allocation3 + $0x140] sm:$0xff]  ;;  %v187_v34 = vld [vmem:[#allocation3 + $0x48] sm:$0xff] }
  0x28   :  { %1219 = vmatpush3.msra.mxu0 %v252_v5  ;;  %1357 = vmatpush3.msra.mxu1 %v252_v5  ;;  %v219_v35 = vld [vmem:[#allocation3 + $0x148] sm:$0xff]  ;;  %v188_v36 = vld [vmem:[#allocation3 + $0x50] sm:$0xff]  ;;  %v189_v38 = vld [vmem:[#allocation3 + $0x58] sm:$0xff] }
  0x29   :  { %1220 = vmatprep.subr.mxu0 %v251_v6  ;;  %1342 = vmatprep.subr.mxu1 %v251_v6  ;;  %v220_v37 = vld [vmem:[#allocation3 + $0x150] sm:$0xff]  ;;  %v221_v39 = vld [vmem:[#allocation3 + $0x158] sm:$0xff]  ;;  %v190_v40 = vld [vmem:[#allocation3 + $0x60] sm:$0xff] }
  0x2a   :  { %1221 = vmatpush3.msra.mxu0 %v251_v6  ;;  %1358 = vmatpush3.msra.mxu1 %v251_v6  ;;  %v222_v41 = vld [vmem:[#allocation3 + $0x160] sm:$0xff]  ;;  %v191_v42 = vld [vmem:[#allocation3 + $0x68] sm:$0xff]  ;;  %v192_v44 = vld [vmem:[#allocation3 + $0x70] sm:$0xff] }
  0x2b   :  { %1222 = vmatprep.subr.mxu0 %v250_v7  ;;  %1343 = vmatprep.subr.mxu1 %v250_v7  ;;  %v223_v43 = vld [vmem:[#allocation3 + $0x168] sm:$0xff]  ;;  %v224_v45 = vld [vmem:[#allocation3 + $0x170] sm:$0xff]  ;;  %v193_v46 = vld [vmem:[#allocation3 + $0x78] sm:$0xff] }
  0x2c   :  { %1223 = vmatpush3.msra.mxu0 %v250_v7  ;;  %1359 = vmatpush3.msra.mxu1 %v250_v7  ;;  %v225_v47 = vld [vmem:[#allocation3 + $0x178] sm:$0xff]  ;;  %v194_v48 = vld [vmem:[#allocation3 + $0x80] sm:$0xff]  ;;  %v195_v50 = vld [vmem:[#allocation3 + $0x88] sm:$0xff] }
  0x2d   :  { %1224 = vmatprep.subr.mxu0 %v249_v8  ;;  %1344 = vmatprep.subr.mxu1 %v249_v8  ;;  %v226_v49 = vld [vmem:[#allocation3 + $0x180] sm:$0xff]  ;;  %v227_v51 = vld [vmem:[#allocation3 + $0x188] sm:$0xff]  ;;  %v196_v52 = vld [vmem:[#allocation3 + $0x90] sm:$0xff] }
  0x2e   :  { %1225 = vmatpush3.msra.mxu0 %v249_v8  ;;  %1360 = vmatpush3.msra.mxu1 %v249_v8  ;;  %v228_v53 = vld [vmem:[#allocation3 + $0x190] sm:$0xff]  ;;  %v197_v54 = vld [vmem:[#allocation3 + $0x98] sm:$0xff]  ;;  %v198_v56 = vld [vmem:[#allocation3 + $0xa0] sm:$0xff] }
  0x2f   :  { %1226 = vmatprep.subr.mxu0 %v248_v9  ;;  %1345 = vmatprep.subr.mxu1 %v248_v9  ;;  %v229_v55 = vld [vmem:[#allocation3 + $0x198] sm:$0xff]  ;;  %v230_v57 = vld [vmem:[#allocation3 + $0x1a0] sm:$0xff]  ;;  %v199_v58 = vld [vmem:[#allocation3 + $0xa8] sm:$0xff] }
  0x30   :  { %1227 = vmatpush3.msra.mxu0 %v248_v9  ;;  %1361 = vmatpush3.msra.mxu1 %v248_v9  ;;  %v231_v59 = vld [vmem:[#allocation3 + $0x1a8] sm:$0xff]  ;;  %v200_v60 = vld [vmem:[#allocation3 + $0xb0] sm:$0xff]  ;;  %v201_v62 = vld [vmem:[#allocation3 + $0xb8] sm:$0xff] }
  0x31   :  { %1228 = vmatprep.subr.mxu0 %v247_v10  ;;  %1346 = vmatprep.subr.mxu1 %v247_v10  ;;  %v232_v61 = vld [vmem:[#allocation3 + $0x1b0] sm:$0xff]  ;;  %v233_v63 = vld [vmem:[#allocation3 + $0x1b8] sm:$0xff]  ;;  %v202_v0 = vld [vmem:[#allocation3 + $0xc0] sm:$0xff] }
  0x32   :  { %1229 = vmatpush3.msra.mxu0 %v247_v10  ;;  %1362 = vmatpush3.msra.mxu1 %v247_v10  ;;  %v234_v1 = vld [vmem:[#allocation3 + $0x1c0] sm:$0xff]  ;;  %v203_v2 = vld [vmem:[#allocation3 + $0xc8] sm:$0xff]  ;;  %v204_v4 = vld [vmem:[#allocation3 + $0xd0] sm:$0xff] }
  0x33   :  { %1230 = vmatprep.subr.mxu0 %v246_v11  ;;  %1347 = vmatprep.subr.mxu1 %v246_v11  ;;  %v235_v3 = vld [vmem:[#allocation3 + $0x1c8] sm:$0xff]  ;;  %v236_v5 = vld [vmem:[#allocation3 + $0x1d0] sm:$0xff]  ;;  %v205_v6 = vld [vmem:[#allocation3 + $0xd8] sm:$0xff] }
  0x34   :  { %1231 = vmatpush3.msra.mxu0 %v246_v11  ;;  %1363 = vmatpush3.msra.mxu1 %v246_v11  ;;  %v237_v7 = vld [vmem:[#allocation3 + $0x1d8] sm:$0xff]  ;;  %v206_v8 = vld [vmem:[#allocation3 + $0xe0] sm:$0xff]  ;;  %v207_v10 = vld [vmem:[#allocation3 + $0xe8] sm:$0xff] }
  0x35   :  { %1232 = vmatprep.subr.mxu0 %v245_v12  ;;  %1348 = vmatprep.subr.mxu1 %v245_v12  ;;  %v238_v9 = vld [vmem:[#allocation3 + $0x1e0] sm:$0xff]  ;;  %v239_v11 = vld [vmem:[#allocation3 + $0x1e8] sm:$0xff] }
  0x36   :  { %1233 = vmatpush3.msra.mxu0 %v245_v12  ;;  %1364 = vmatpush3.msra.mxu1 %v245_v12  ;;  %v208_v12 = vld [vmem:[#allocation3 + $0xf0] sm:$0xff] }
  0x37   :  { %1234 = vmatprep.subr.mxu0 %v244_v13  ;;  %1349 = vmatprep.subr.mxu1 %v244_v13 }
  0x38   :  { %1235 = vmatpush3.msra.mxu0 %v244_v13  ;;  %1365 = vmatpush3.msra.mxu1 %v244_v13  ;;  %v240_v13 = vld [vmem:[#allocation3 + $0x1f0] sm:$0xff] }
  0x39   :  { %1236 = vmatprep.subr.mxu0 %v243_v14  ;;  %1350 = vmatprep.subr.mxu1 %v243_v14 }
  0x3a   :  { %1237 = vmatpush3.msra.mxu0 %v243_v14  ;;  %1366 = vmatpush3.msra.mxu1 %v243_v14  ;;  %v209_v14 = vld [vmem:[#allocation3 + $0xf8] sm:$0xff] }
  0x3b   :  { %1238 = vmatprep.subr.mxu0 %v242_v15  ;;  %1351 = vmatprep.subr.mxu1 %v242_v15 }
  0x3c   :  { %1239 = vmatpush3.msra.mxu0 %v242_v15  ;;  %1367 = vmatpush3.msra.mxu1 %v242_v15  ;;  %v241_v15 = vld [vmem:[#allocation3 + $0x1f8] sm:$0xff] }
  0x3d   :  { %1240 = vmatprep.mubr.f32.mxu0 %v178_v16  ;;  %1288 = vmatprep.mubr.f32.mxu1 %v210_v17  ;;  %v1484_v16 = vld [vmem:[%s1627_s2] ss:$0 sm:$0xff]  ;;  %s1443_s2 = smov [#allocation8]  }
  0x3e   :  { %1241 = vmatmul.mubr.f32.vlgmr.msra.gmra.mxu0 %v179_v18  ;;  %1289 = vmatmul.mubr.f32.vlgmr.msra.gmra.mxu1 %v211_v19  ;;  %v1489_v18 = vld [vmem:[%s1628_s3] ss:$0 sm:$0xff]  ;;  %s1113_s3 = sshll.u32 %s1443_s2, 4  ;;  %s1114_s3 = int_to_ptr.vmem [resolvable:$true] %s1113_s3 }
  0x3f   :  { %1243 = vmatprep.mubr.f32.mxu0 %v180_v20  ;;  %1291 = vmatprep.mubr.f32.mxu1 %v212_v21  ;;  %s1413_s29 = scalar_lea.vmem %s1114_s3, 8192  ;;  %p1418_p11 = scmp.lt.s32.totalorder %s1114_s3, %s1114_s3 }
  0x40   :  { %p1414_p10 = scmp.ne.s32.totalorder %s1114_s3, %s1413_s29  ;;  %p1419_p12 = scmp.lt.s32.totalorder %s1413_s29, %s1413_s29 }
  0x42   :  { %1244 = vmatmul.mubr.f32.gmra.mxu0 %v181_v22  ;;  %1292 = vmatmul.mubr.f32.gmra.mxu1 %v213_v23  ;;  %p1420_p13 = por %p1419_p12, %p1418_p11 }
  0x43   :  { %1246 = vmatprep.mubr.f32.mxu0 %v182_v24  ;;  %1294 = vmatprep.mubr.f32.mxu1 %v214_v25 }
  0x44   :  { %p1421_p0 = pnand %p1420_p13, %p1414_p10 }
  0x46   :  { %1247 = vmatmul.mubr.f32.gmra.mxu0 %v183_v26  ;;  %1295 = vmatmul.mubr.f32.gmra.mxu1 %v215_v27 }
  0x47   :  { %1249 = vmatprep.mubr.f32.mxu0 %v184_v28  ;;  %1297 = vmatprep.mubr.f32.mxu1 %v216_v29 }
  0x4a   :  { %1250 = vmatmul.mubr.f32.gmra.mxu0 %v185_v30  ;;  %1298 = vmatmul.mubr.f32.gmra.mxu1 %v217_v31 }
  0x4b   :  { %1252 = vmatprep.mubr.f32.mxu0 %v186_v32  ;;  %1300 = vmatprep.mubr.f32.mxu1 %v218_v33 }
  0x4e   :  { %1253 = vmatmul.mubr.f32.gmra.mxu0 %v187_v34  ;;  %1301 = vmatmul.mubr.f32.gmra.mxu1 %v219_v35 }
  0x4f   :  { %1255 = vmatprep.mubr.f32.mxu0 %v188_v36  ;;  %1303 = vmatprep.mubr.f32.mxu1 %v220_v37 }
  0x52   :  { %1256 = vmatmul.mubr.f32.gmra.mxu0 %v189_v38  ;;  %1304 = vmatmul.mubr.f32.gmra.mxu1 %v221_v39 }
  0x53   :  { %1258 = vmatprep.mubr.f32.mxu0 %v190_v40  ;;  %1306 = vmatprep.mubr.f32.mxu1 %v222_v41 }
  0x56   :  { %1259 = vmatmul.mubr.f32.gmra.mxu0 %v191_v42  ;;  %1307 = vmatmul.mubr.f32.gmra.mxu1 %v223_v43 }
  0x57   :  { %1261 = vmatprep.mubr.f32.mxu0 %v192_v44  ;;  %1309 = vmatprep.mubr.f32.mxu1 %v224_v45 }
  0x5a   :  { %1262 = vmatmul.mubr.f32.gmra.mxu0 %v193_v46  ;;  %1310 = vmatmul.mubr.f32.gmra.mxu1 %v225_v47 }
  0x5b   :  { %1264 = vmatprep.mubr.f32.mxu0 %v194_v48  ;;  %1312 = vmatprep.mubr.f32.mxu1 %v226_v49 }
  0x5e   :  { %1265 = vmatmul.mubr.f32.gmra.mxu0 %v195_v50  ;;  %1313 = vmatmul.mubr.f32.gmra.mxu1 %v227_v51 }
  0x5f   :  { %1267 = vmatprep.mubr.f32.mxu0 %v196_v52  ;;  %1315 = vmatprep.mubr.f32.mxu1 %v228_v53 }
  0x62   :  { %1268 = vmatmul.mubr.f32.gmra.mxu0 %v197_v54  ;;  %1316 = vmatmul.mubr.f32.gmra.mxu1 %v229_v55 }
  0x63   :  { %1270 = vmatprep.mubr.f32.mxu0 %v198_v56  ;;  %1318 = vmatprep.mubr.f32.mxu1 %v230_v57 }
  0x66   :  { %1271 = vmatmul.mubr.f32.gmra.mxu0 %v199_v58  ;;  %1319 = vmatmul.mubr.f32.gmra.mxu1 %v231_v59 }
  0x67   :  { %1273 = vmatprep.mubr.f32.mxu0 %v200_v60  ;;  %1321 = vmatprep.mubr.f32.mxu1 %v232_v61 }
  0x6a   :  { %1274 = vmatmul.mubr.f32.gmra.mxu0 %v201_v62  ;;  %1322 = vmatmul.mubr.f32.gmra.mxu1 %v233_v63 }
  0x6b   :  { %1276 = vmatprep.mubr.f32.mxu0 %v202_v0  ;;  %1324 = vmatprep.mubr.f32.mxu1 %v234_v1 }
  0x6e   :  { %1277 = vmatmul.mubr.f32.gmra.mxu0 %v203_v2  ;;  %1325 = vmatmul.mubr.f32.gmra.mxu1 %v235_v3 }
  0x6f   :  { %1279 = vmatprep.mubr.f32.mxu0 %v204_v4  ;;  %1327 = vmatprep.mubr.f32.mxu1 %v236_v5 }
  0x72   :  { %1280 = vmatmul.mubr.f32.gmra.mxu0 %v205_v6  ;;  %1328 = vmatmul.mubr.f32.gmra.mxu1 %v237_v7 }
  0x73   :  { %1282 = vmatprep.mubr.f32.mxu0 %v206_v8  ;;  %1330 = vmatprep.mubr.f32.mxu1 %v238_v9 }
  0x76   :  { %1283 = vmatmul.mubr.f32.gmra.mxu0 %v207_v10  ;;  %1331 = vmatmul.mubr.f32.gmra.mxu1 %v239_v11 }
  0x77   :  { %1285 = vmatprep.mubr.f32.mxu0 %v208_v12  ;;  %1333 = vmatprep.mubr.f32.mxu1 %v240_v13 }
  0x7a   :  { %1286 = vmatmul.mubr.f32.gmra.mxu0 %v209_v14  ;;  %1334 = vmatmul.mubr.f32.gmra.mxu1 %v241_v15 }
  0xfe   :  { %v1242_v17 = vpop.f32.mrf.mxu0  ;;  %v1290_v19 = vpop.f32.mrf.mxu1 }
  0xff   :  { %v846_v20 = vmul.f32 %v1242_v17, %v1484_v16  ;;  %v878_v21 = vmul.f32 %v1290_v19, %v1484_v16 }
 0x100   :  { %v324_v22 = vpop.f32.mrf.mxu0  ;;  %v484_v23 = vpop.f32.mrf.mxu1 }
 0x101   :  { %v917_v24 = vadd.f32 %v1489_v18, %v846_v20  ;;  %v949_v25 = vadd.f32 %v1489_v18, %v878_v21  ;;  %v845_v26 = vmul.f32 %v1484_v16, %v324_v22  ;;  %v877_v27 = vmul.f32 %v1484_v16, %v484_v23 }
 0x102   :  { %v1245_v28 = vpop.f32.mrf.mxu0  ;;  %v1293_v29 = vpop.f32.mrf.mxu1 }
 0x103   :  { %v981_v30 = vmax.f32 %v917_v24, 0.0  ;;  %v1013_v31 = vmax.f32 %v949_v25, 0.0  ;;  %v916_v32 = vadd.f32 %v1489_v18, %v845_v26  ;;  %v948_v33 = vadd.f32 %v1489_v18, %v877_v27 }
 0x104   :  { %v848_v34 = vmul.f32 %v1245_v28, %v1484_v16  ;;  %v880_v35 = vmul.f32 %v1293_v29, %v1484_v16  ;;  %v334_v36 = vpop.f32.mrf.mxu0  ;;  %v494_v37 = vpop.f32.mrf.mxu1 }
 0x105   :  { %1045 = vst [vmem:[#allocation8 + $0x8] sm:$0xff] %v981_v30  ;;  %1077 = vst [vmem:[#allocation8 + $0x108] sm:$0xff] %v1013_v31  ;;  %v980_v38 = vmax.f32 %v916_v32, 0.0  ;;  %v1012_v39 = vmax.f32 %v948_v33, 0.0  ;;  %v847_v40 = vmul.f32 %v1484_v16, %v334_v36  ;;  %v879_v41 = vmul.f32 %v1484_v16, %v494_v37 }
 0x106   :  { %v919_v42 = vadd.f32 %v1489_v18, %v848_v34  ;;  %v951_v43 = vadd.f32 %v1489_v18, %v880_v35  ;;  %v1248_v44 = vpop.f32.mrf.mxu0  ;;  %v1296_v45 = vpop.f32.mrf.mxu1 }
 0x107   :  { %1044 = vst [vmem:[#allocation8] sm:$0xff] %v980_v38  ;;  %1076 = vst [vmem:[#allocation8 + $0x100] sm:$0xff] %v1012_v39  ;;  %v918_v46 = vadd.f32 %v1489_v18, %v847_v40  ;;  %v950_v47 = vadd.f32 %v1489_v18, %v879_v41  ;;  %v850_v48 = vmul.f32 %v1248_v44, %v1484_v16 }
 0x108   :  { %v882_v49 = vmul.f32 %v1296_v45, %v1484_v16  ;;  %v983_v50 = vmax.f32 %v919_v42, 0.0  ;;  %v1015_v51 = vmax.f32 %v951_v43, 0.0  ;;  %v344_v52 = vpop.f32.mrf.mxu0  ;;  %v504_v53 = vpop.f32.mrf.mxu1 }
 0x109   :  { %v982_v54 = vmax.f32 %v918_v46, 0.0  ;;  %v1014_v55 = vmax.f32 %v950_v47, 0.0  ;;  %v921_v56 = vadd.f32 %v1489_v18, %v850_v48  ;;  %v849_v58 = vmul.f32 %v1484_v16, %v344_v52 }
 0x10a   :  { %v953_v57 = vadd.f32 %v1489_v18, %v882_v49  ;;  %1047 = vst [vmem:[#allocation8 + $0x18] sm:$0xff] %v983_v50  ;;  %1079 = vst [vmem:[#allocation8 + $0x118] sm:$0xff] %v1015_v51  ;;  %v881_v59 = vmul.f32 %v1484_v16, %v504_v53  ;;  %v1251_v60 = vpop.f32.mrf.mxu0  ;;  %v1299_v61 = vpop.f32.mrf.mxu1 }
 0x10b   :  { %1046 = vst [vmem:[#allocation8 + $0x10] sm:$0xff] %v982_v54  ;;  %1078 = vst [vmem:[#allocation8 + $0x110] sm:$0xff] %v1014_v55  ;;  %v985_v62 = vmax.f32 %v921_v56, 0.0  ;;  %v852_v0 = vmul.f32 %v1251_v60, %v1484_v16  ;;  %v884_v1 = vmul.f32 %v1299_v61, %v1484_v16  ;;  %v920_v2 = vadd.f32 %v1489_v18, %v849_v58 }
 0x10c   :  { %v1017_v63 = vmax.f32 %v953_v57, 0.0  ;;  %v952_v3 = vadd.f32 %v1489_v18, %v881_v59  ;;  %v354_v4 = vpop.f32.mrf.mxu0  ;;  %v514_v5 = vpop.f32.mrf.mxu1 }
 0x10d   :  { %1049 = vst [vmem:[#allocation8 + $0x28] sm:$0xff] %v985_v62  ;;  %v923_v6 = vadd.f32 %v1489_v18, %v852_v0  ;;  %v955_v7 = vadd.f32 %v1489_v18, %v884_v1  ;;  %v851_v8 = vmul.f32 %v1484_v16, %v354_v4  ;;  %v883_v9 = vmul.f32 %v1484_v16, %v514_v5 }
 0x10e   :  { %1081 = vst [vmem:[#allocation8 + $0x128] sm:$0xff] %v1017_v63  ;;  %v984_v10 = vmax.f32 %v920_v2, 0.0  ;;  %v1016_v11 = vmax.f32 %v952_v3, 0.0  ;;  %v1254_v12 = vpop.f32.mrf.mxu0  ;;  %v1302_v13 = vpop.f32.mrf.mxu1 }
 0x10f   :  { %v987_v14 = vmax.f32 %v923_v6, 0.0  ;;  %v1019_v15 = vmax.f32 %v955_v7, 0.0  ;;  %v922_v17 = vadd.f32 %v1489_v18, %v851_v8  ;;  %v954_v19 = vadd.f32 %v1489_v18, %v883_v9 }
 0x110   :  { %1048 = vst [vmem:[#allocation8 + $0x20] sm:$0xff] %v984_v10  ;;  %1080 = vst [vmem:[#allocation8 + $0x120] sm:$0xff] %v1016_v11  ;;  %v854_v20 = vmul.f32 %v1254_v12, %v1484_v16  ;;  %v886_v21 = vmul.f32 %v1302_v13, %v1484_v16  ;;  %v364_v22 = vpop.f32.mrf.mxu0  ;;  %v524_v23 = vpop.f32.mrf.mxu1 }
 0x111   :  { %1051 = vst [vmem:[#allocation8 + $0x38] sm:$0xff] %v987_v14  ;;  %1083 = vst [vmem:[#allocation8 + $0x138] sm:$0xff] %v1019_v15  ;;  %v986_v24 = vmax.f32 %v922_v17, 0.0  ;;  %v1018_v25 = vmax.f32 %v954_v19, 0.0  ;;  %v853_v26 = vmul.f32 %v1484_v16, %v364_v22  ;;  %v885_v27 = vmul.f32 %v1484_v16, %v524_v23 }
 0x112   :  { %v925_v28 = vadd.f32 %v1489_v18, %v854_v20  ;;  %v957_v29 = vadd.f32 %v1489_v18, %v886_v21  ;;  %v1257_v30 = vpop.f32.mrf.mxu0  ;;  %v1305_v31 = vpop.f32.mrf.mxu1 }
 0x113   :  { %1050 = vst [vmem:[#allocation8 + $0x30] sm:$0xff] %v986_v24  ;;  %1082 = vst [vmem:[#allocation8 + $0x130] sm:$0xff] %v1018_v25  ;;  %v924_v32 = vadd.f32 %v1489_v18, %v853_v26  ;;  %v956_v33 = vadd.f32 %v1489_v18, %v885_v27  ;;  %v856_v34 = vmul.f32 %v1257_v30, %v1484_v16 }
 0x114   :  { %v888_v35 = vmul.f32 %v1305_v31, %v1484_v16  ;;  %v989_v36 = vmax.f32 %v925_v28, 0.0  ;;  %v1021_v37 = vmax.f32 %v957_v29, 0.0  ;;  %v374_v38 = vpop.f32.mrf.mxu0  ;;  %v534_v39 = vpop.f32.mrf.mxu1 }
 0x115   :  { %v988_v40 = vmax.f32 %v924_v32, 0.0  ;;  %v1020_v41 = vmax.f32 %v956_v33, 0.0  ;;  %v927_v42 = vadd.f32 %v1489_v18, %v856_v34  ;;  %v855_v44 = vmul.f32 %v1484_v16, %v374_v38 }
 0x116   :  { %v959_v43 = vadd.f32 %v1489_v18, %v888_v35  ;;  %1053 = vst [vmem:[#allocation8 + $0x48] sm:$0xff] %v989_v36  ;;  %1085 = vst [vmem:[#allocation8 + $0x148] sm:$0xff] %v1021_v37  ;;  %v887_v45 = vmul.f32 %v1484_v16, %v534_v39  ;;  %v1260_v46 = vpop.f32.mrf.mxu0  ;;  %v1308_v47 = vpop.f32.mrf.mxu1 }
 0x117   :  { %1052 = vst [vmem:[#allocation8 + $0x40] sm:$0xff] %v988_v40  ;;  %1084 = vst [vmem:[#allocation8 + $0x140] sm:$0xff] %v1020_v41  ;;  %v991_v48 = vmax.f32 %v927_v42, 0.0  ;;  %v858_v50 = vmul.f32 %v1260_v46, %v1484_v16  ;;  %v890_v51 = vmul.f32 %v1308_v47, %v1484_v16  ;;  %v926_v52 = vadd.f32 %v1489_v18, %v855_v44 }
 0x118   :  { %v1023_v49 = vmax.f32 %v959_v43, 0.0  ;;  %v958_v53 = vadd.f32 %v1489_v18, %v887_v45  ;;  %v384_v54 = vpop.f32.mrf.mxu0  ;;  %v544_v55 = vpop.f32.mrf.mxu1 }
 0x119   :  { %1055 = vst [vmem:[#allocation8 + $0x58] sm:$0xff] %v991_v48  ;;  %v929_v56 = vadd.f32 %v1489_v18, %v858_v50  ;;  %v961_v57 = vadd.f32 %v1489_v18, %v890_v51  ;;  %v857_v58 = vmul.f32 %v1484_v16, %v384_v54  ;;  %v889_v59 = vmul.f32 %v1484_v16, %v544_v55 }
 0x11a   :  { %1087 = vst [vmem:[#allocation8 + $0x158] sm:$0xff] %v1023_v49  ;;  %v990_v60 = vmax.f32 %v926_v52, 0.0  ;;  %v1022_v61 = vmax.f32 %v958_v53, 0.0  ;;  %v1263_v62 = vpop.f32.mrf.mxu0  ;;  %v1311_v63 = vpop.f32.mrf.mxu1 }
 0x11b   :  { %v993_v0 = vmax.f32 %v929_v56, 0.0  ;;  %v1025_v1 = vmax.f32 %v961_v57, 0.0  ;;  %v928_v2 = vadd.f32 %v1489_v18, %v857_v58  ;;  %v960_v3 = vadd.f32 %v1489_v18, %v889_v59 }
 0x11c   :  { %1054 = vst [vmem:[#allocation8 + $0x50] sm:$0xff] %v990_v60  ;;  %1086 = vst [vmem:[#allocation8 + $0x150] sm:$0xff] %v1022_v61  ;;  %v860_v4 = vmul.f32 %v1263_v62, %v1484_v16  ;;  %v892_v5 = vmul.f32 %v1311_v63, %v1484_v16  ;;  %v394_v6 = vpop.f32.mrf.mxu0  ;;  %v554_v7 = vpop.f32.mrf.mxu1 }
 0x11d   :  { %1057 = vst [vmem:[#allocation8 + $0x68] sm:$0xff] %v993_v0  ;;  %1089 = vst [vmem:[#allocation8 + $0x168] sm:$0xff] %v1025_v1  ;;  %v992_v8 = vmax.f32 %v928_v2, 0.0  ;;  %v1024_v9 = vmax.f32 %v960_v3, 0.0  ;;  %v859_v10 = vmul.f32 %v1484_v16, %v394_v6  ;;  %v891_v11 = vmul.f32 %v1484_v16, %v554_v7 }
 0x11e   :  { %v931_v12 = vadd.f32 %v1489_v18, %v860_v4  ;;  %v963_v13 = vadd.f32 %v1489_v18, %v892_v5  ;;  %v1266_v14 = vpop.f32.mrf.mxu0  ;;  %v1314_v15 = vpop.f32.mrf.mxu1 }
 0x11f   :  { %1056 = vst [vmem:[#allocation8 + $0x60] sm:$0xff] %v992_v8  ;;  %1088 = vst [vmem:[#allocation8 + $0x160] sm:$0xff] %v1024_v9  ;;  %v930_v17 = vadd.f32 %v1489_v18, %v859_v10  ;;  %v962_v19 = vadd.f32 %v1489_v18, %v891_v11  ;;  %v862_v20 = vmul.f32 %v1266_v14, %v1484_v16 }
 0x120   :  { %v894_v21 = vmul.f32 %v1314_v15, %v1484_v16  ;;  %v995_v22 = vmax.f32 %v931_v12, 0.0  ;;  %v1027_v23 = vmax.f32 %v963_v13, 0.0  ;;  %v404_v24 = vpop.f32.mrf.mxu0  ;;  %v564_v25 = vpop.f32.mrf.mxu1 }
 0x121   :  { %v994_v26 = vmax.f32 %v930_v17, 0.0  ;;  %v1026_v27 = vmax.f32 %v962_v19, 0.0  ;;  %v933_v28 = vadd.f32 %v1489_v18, %v862_v20  ;;  %v861_v30 = vmul.f32 %v1484_v16, %v404_v24 }
 0x122   :  { %v965_v29 = vadd.f32 %v1489_v18, %v894_v21  ;;  %1059 = vst [vmem:[#allocation8 + $0x78] sm:$0xff] %v995_v22  ;;  %1091 = vst [vmem:[#allocation8 + $0x178] sm:$0xff] %v1027_v23  ;;  %v893_v31 = vmul.f32 %v1484_v16, %v564_v25  ;;  %v1269_v32 = vpop.f32.mrf.mxu0  ;;  %v1317_v33 = vpop.f32.mrf.mxu1 }
 0x123   :  { %1058 = vst [vmem:[#allocation8 + $0x70] sm:$0xff] %v994_v26  ;;  %1090 = vst [vmem:[#allocation8 + $0x170] sm:$0xff] %v1026_v27  ;;  %v997_v34 = vmax.f32 %v933_v28, 0.0  ;;  %v864_v36 = vmul.f32 %v1269_v32, %v1484_v16  ;;  %v896_v37 = vmul.f32 %v1317_v33, %v1484_v16  ;;  %v932_v38 = vadd.f32 %v1489_v18, %v861_v30 }
 0x124   :  { %v1029_v35 = vmax.f32 %v965_v29, 0.0  ;;  %v964_v39 = vadd.f32 %v1489_v18, %v893_v31  ;;  %v414_v40 = vpop.f32.mrf.mxu0  ;;  %v574_v41 = vpop.f32.mrf.mxu1 }
 0x125   :  { %1061 = vst [vmem:[#allocation8 + $0x88] sm:$0xff] %v997_v34  ;;  %v935_v42 = vadd.f32 %v1489_v18, %v864_v36  ;;  %v967_v43 = vadd.f32 %v1489_v18, %v896_v37  ;;  %v863_v44 = vmul.f32 %v1484_v16, %v414_v40  ;;  %v895_v45 = vmul.f32 %v1484_v16, %v574_v41 }
 0x126   :  { %1093 = vst [vmem:[#allocation8 + $0x188] sm:$0xff] %v1029_v35  ;;  %v996_v46 = vmax.f32 %v932_v38, 0.0  ;;  %v1028_v47 = vmax.f32 %v964_v39, 0.0  ;;  %v1272_v48 = vpop.f32.mrf.mxu0  ;;  %v1320_v49 = vpop.f32.mrf.mxu1 }
 0x127   :  { %v999_v50 = vmax.f32 %v935_v42, 0.0  ;;  %v1031_v51 = vmax.f32 %v967_v43, 0.0  ;;  %v934_v52 = vadd.f32 %v1489_v18, %v863_v44  ;;  %v966_v53 = vadd.f32 %v1489_v18, %v895_v45 }
 0x128   :  { %1060 = vst [vmem:[#allocation8 + $0x80] sm:$0xff] %v996_v46  ;;  %1092 = vst [vmem:[#allocation8 + $0x180] sm:$0xff] %v1028_v47  ;;  %v866_v54 = vmul.f32 %v1272_v48, %v1484_v16  ;;  %v898_v55 = vmul.f32 %v1320_v49, %v1484_v16  ;;  %v424_v56 = vpop.f32.mrf.mxu0  ;;  %v584_v57 = vpop.f32.mrf.mxu1 }
 0x129   :  { %1063 = vst [vmem:[#allocation8 + $0x98] sm:$0xff] %v999_v50  ;;  %1095 = vst [vmem:[#allocation8 + $0x198] sm:$0xff] %v1031_v51  ;;  %v998_v58 = vmax.f32 %v934_v52, 0.0  ;;  %v1030_v59 = vmax.f32 %v966_v53, 0.0  ;;  %v865_v60 = vmul.f32 %v1484_v16, %v424_v56  ;;  %v897_v61 = vmul.f32 %v1484_v16, %v584_v57 }
 0x12a   :  { %v937_v62 = vadd.f32 %v1489_v18, %v866_v54  ;;  %v969_v63 = vadd.f32 %v1489_v18, %v898_v55  ;;  %v1275_v0 = vpop.f32.mrf.mxu0  ;;  %v1323_v1 = vpop.f32.mrf.mxu1 }
 0x12b   :  { %1062 = vst [vmem:[#allocation8 + $0x90] sm:$0xff] %v998_v58  ;;  %1094 = vst [vmem:[#allocation8 + $0x190] sm:$0xff] %v1030_v59  ;;  %v936_v2 = vadd.f32 %v1489_v18, %v865_v60  ;;  %v968_v3 = vadd.f32 %v1489_v18, %v897_v61  ;;  %v868_v4 = vmul.f32 %v1275_v0, %v1484_v16 }
 0x12c   :  { %v900_v5 = vmul.f32 %v1323_v1, %v1484_v16  ;;  %v1001_v6 = vmax.f32 %v937_v62, 0.0  ;;  %v1033_v7 = vmax.f32 %v969_v63, 0.0  ;;  %v434_v8 = vpop.f32.mrf.mxu0  ;;  %v594_v9 = vpop.f32.mrf.mxu1 }
 0x12d   :  { %v1000_v10 = vmax.f32 %v936_v2, 0.0  ;;  %v1032_v11 = vmax.f32 %v968_v3, 0.0  ;;  %v939_v12 = vadd.f32 %v1489_v18, %v868_v4  ;;  %v867_v14 = vmul.f32 %v1484_v16, %v434_v8 }
 0x12e   :  { %v971_v13 = vadd.f32 %v1489_v18, %v900_v5  ;;  %1065 = vst [vmem:[#allocation8 + $0xa8] sm:$0xff] %v1001_v6  ;;  %1097 = vst [vmem:[#allocation8 + $0x1a8] sm:$0xff] %v1033_v7  ;;  %v899_v15 = vmul.f32 %v1484_v16, %v594_v9  ;;  %v1278_v17 = vpop.f32.mrf.mxu0  ;;  %v1326_v19 = vpop.f32.mrf.mxu1 }
 0x12f   :  { %1064 = vst [vmem:[#allocation8 + $0xa0] sm:$0xff] %v1000_v10  ;;  %1096 = vst [vmem:[#allocation8 + $0x1a0] sm:$0xff] %v1032_v11  ;;  %v1003_v20 = vmax.f32 %v939_v12, 0.0  ;;  %v870_v22 = vmul.f32 %v1278_v17, %v1484_v16  ;;  %v902_v23 = vmul.f32 %v1326_v19, %v1484_v16  ;;  %v938_v24 = vadd.f32 %v1489_v18, %v867_v14 }
 0x130   :  { %v1035_v21 = vmax.f32 %v971_v13, 0.0  ;;  %v970_v25 = vadd.f32 %v1489_v18, %v899_v15  ;;  %v444_v26 = vpop.f32.mrf.mxu0  ;;  %v604_v27 = vpop.f32.mrf.mxu1 }
 0x131   :  { %1067 = vst [vmem:[#allocation8 + $0xb8] sm:$0xff] %v1003_v20  ;;  %v941_v28 = vadd.f32 %v1489_v18, %v870_v22  ;;  %v973_v29 = vadd.f32 %v1489_v18, %v902_v23  ;;  %v869_v30 = vmul.f32 %v1484_v16, %v444_v26  ;;  %v901_v31 = vmul.f32 %v1484_v16, %v604_v27 }
 0x132   :  { %1099 = vst [vmem:[#allocation8 + $0x1b8] sm:$0xff] %v1035_v21  ;;  %v1002_v32 = vmax.f32 %v938_v24, 0.0  ;;  %v1034_v33 = vmax.f32 %v970_v25, 0.0  ;;  %v1281_v34 = vpop.f32.mrf.mxu0  ;;  %v1329_v35 = vpop.f32.mrf.mxu1 }
 0x133   :  { %v1005_v36 = vmax.f32 %v941_v28, 0.0  ;;  %v1037_v37 = vmax.f32 %v973_v29, 0.0  ;;  %v940_v38 = vadd.f32 %v1489_v18, %v869_v30  ;;  %v972_v39 = vadd.f32 %v1489_v18, %v901_v31 }
 0x134   :  { %1066 = vst [vmem:[#allocation8 + $0xb0] sm:$0xff] %v1002_v32  ;;  %1098 = vst [vmem:[#allocation8 + $0x1b0] sm:$0xff] %v1034_v33  ;;  %v872_v40 = vmul.f32 %v1281_v34, %v1484_v16  ;;  %v904_v41 = vmul.f32 %v1329_v35, %v1484_v16  ;;  %v454_v42 = vpop.f32.mrf.mxu0  ;;  %v614_v43 = vpop.f32.mrf.mxu1 }
 0x135   :  { %1069 = vst [vmem:[#allocation8 + $0xc8] sm:$0xff] %v1005_v36  ;;  %1101 = vst [vmem:[#allocation8 + $0x1c8] sm:$0xff] %v1037_v37  ;;  %v1004_v44 = vmax.f32 %v940_v38, 0.0  ;;  %v1036_v45 = vmax.f32 %v972_v39, 0.0  ;;  %v871_v46 = vmul.f32 %v1484_v16, %v454_v42  ;;  %v903_v47 = vmul.f32 %v1484_v16, %v614_v43 }
 0x136   :  { %v943_v48 = vadd.f32 %v1489_v18, %v872_v40  ;;  %v975_v49 = vadd.f32 %v1489_v18, %v904_v41  ;;  %v1284_v50 = vpop.f32.mrf.mxu0  ;;  %v1332_v51 = vpop.f32.mrf.mxu1 }
 0x137   :  { %1068 = vst [vmem:[#allocation8 + $0xc0] sm:$0xff] %v1004_v44  ;;  %1100 = vst [vmem:[#allocation8 + $0x1c0] sm:$0xff] %v1036_v45  ;;  %v942_v52 = vadd.f32 %v1489_v18, %v871_v46  ;;  %v974_v53 = vadd.f32 %v1489_v18, %v903_v47  ;;  %v874_v54 = vmul.f32 %v1284_v50, %v1484_v16 }
 0x138   :  { %v906_v55 = vmul.f32 %v1332_v51, %v1484_v16  ;;  %v1007_v56 = vmax.f32 %v943_v48, 0.0  ;;  %v1039_v57 = vmax.f32 %v975_v49, 0.0  ;;  %v464_v58 = vpop.f32.mrf.mxu0  ;;  %v624_v59 = vpop.f32.mrf.mxu1 }
 0x139   :  { %v1006_v60 = vmax.f32 %v942_v52, 0.0  ;;  %v1038_v61 = vmax.f32 %v974_v53, 0.0  ;;  %v945_v62 = vadd.f32 %v1489_v18, %v874_v54  ;;  %v873_v0 = vmul.f32 %v1484_v16, %v464_v58 }
 0x13a   :  { %v977_v63 = vadd.f32 %v1489_v18, %v906_v55  ;;  %1071 = vst [vmem:[#allocation8 + $0xd8] sm:$0xff] %v1007_v56  ;;  %1103 = vst [vmem:[#allocation8 + $0x1d8] sm:$0xff] %v1039_v57  ;;  %v905_v1 = vmul.f32 %v1484_v16, %v624_v59  ;;  %v1287_v2 = vpop.f32.mrf.mxu0  ;;  %v1335_v3 = vpop.f32.mrf.mxu1 }
 0x13b   :  { %1070 = vst [vmem:[#allocation8 + $0xd0] sm:$0xff] %v1006_v60  ;;  %1102 = vst [vmem:[#allocation8 + $0x1d0] sm:$0xff] %v1038_v61  ;;  %v1009_v4 = vmax.f32 %v945_v62, 0.0  ;;  %v876_v6 = vmul.f32 %v1287_v2, %v1484_v16  ;;  %v908_v7 = vmul.f32 %v1335_v3, %v1484_v16  ;;  %v944_v8 = vadd.f32 %v1489_v18, %v873_v0 }
 0x13c   :  { %v1041_v5 = vmax.f32 %v977_v63, 0.0  ;;  %v976_v9 = vadd.f32 %v1489_v18, %v905_v1  ;;  %v474_v10 = vpop.f32.mrf.mxu0  ;;  %v634_v11 = vpop.f32.mrf.mxu1 }
 0x13d   :  { %1073 = vst [vmem:[#allocation8 + $0xe8] sm:$0xff] %v1009_v4  ;;  %v947_v12 = vadd.f32 %v1489_v18, %v876_v6  ;;  %v979_v13 = vadd.f32 %v1489_v18, %v908_v7  ;;  %v875_v14 = vmul.f32 %v1484_v16, %v474_v10  ;;  %v907_v15 = vmul.f32 %v1484_v16, %v634_v11 }
 0x13e   :  { %1105 = vst [vmem:[#allocation8 + $0x1e8] sm:$0xff] %v1041_v5  ;;  %v1008_v17 = vmax.f32 %v944_v8, 0.0  ;;  %v1040_v19 = vmax.f32 %v976_v9, 0.0 }
 0x13f   :  { %v1011_v20 = vmax.f32 %v947_v12, 0.0  ;;  %v1043_v21 = vmax.f32 %v979_v13, 0.0  ;;  %v946_v22 = vadd.f32 %v1489_v18, %v875_v14  ;;  %v978_v23 = vadd.f32 %v1489_v18, %v907_v15 }
 0x140   :  { %1072 = vst [vmem:[#allocation8 + $0xe0] sm:$0xff] %v1008_v17  ;;  %1104 = vst [vmem:[#allocation8 + $0x1e0] sm:$0xff] %v1040_v19 }
 0x141   :  { %1075 = vst [vmem:[#allocation8 + $0xf8] sm:$0xff] %v1011_v20  ;;  %1107 = vst [vmem:[#allocation8 + $0x1f8] sm:$0xff] %v1043_v21  ;;  %v1010_v24 = vmax.f32 %v946_v22, 0.0  ;;  %v1042_v25 = vmax.f32 %v978_v23, 0.0 }
 0x143   :  { %1074 = vst [vmem:[#allocation8 + $0xf0] sm:$0xff] %v1010_v24  ;;  %1106 = vst [vmem:[#allocation8 + $0x1f0] sm:$0xff] %v1042_v25 }
 0x144   :  { %1424 = shalt.err (!%p1421_p0)
}
 0x145   :  { %1119 = dma.vmem_to_hbm [thread:$0]  %s1114_s3, 8192, %s1629_s4, [#allocation5], %s1440_s18, %s1440_s18, %s1441_s19  }
 0x146   :  { %1437 = dma.done.wait [#allocation5], 8192  }
 0x147   :  { %1438 = vsyncadd [#allocation5], 4294959104 }
 0x148   :  { %1123 = vsyncpa [#allocation4], 1 }
 0x149   :  { %1124 = vsyncpa [#allocation7], 1 }
 0x14a   :  { %1125 = vsyncpa [#allocation5], 1 }

</bundles_post_ra>
